<compile_context>
chip_gen: v5e
topology: v5e:2x2
jax: 0.10.0
libtpu: 0.0.40
codegen_flags: <defaults>
</compile_context>

<pallas_src>
import functools
import math

import jax
import jax.numpy as jnp
from jax.experimental import pallas as pl
from jax.experimental.pallas import tpu as pltpu


def _ffunc_kernel(yT_ref,   # VMEM (D, tn)   compute_dtype   (y^T tile, batch on lanes)
                  w_ref,    # VMEM (3, D, D) compute_dtype   [W0y, W1, W2] in (out,in) form
                  b_ref,    # VMEM (3, D, 1) float32         [b0_eff, b1, b2]
                  o_ref,    # VMEM (D, tn)   out dtype
                  *, compute_dtype):
    # Layer 0: Linear(D+2 -> D); sin/cos columns already folded into b_ref[0].
    h = jnp.dot(w_ref[0], yT_ref[...], preferred_element_type=jnp.float32) + b_ref[0]
    h = jnp.tanh(h)

    # Layer 1: Tanh(Linear(D -> D))
    h = jnp.dot(w_ref[1], h.astype(compute_dtype),
                preferred_element_type=jnp.float32) + b_ref[1]
    h = jnp.tanh(h)

    # Layer 2: Linear(D -> D)
    out = jnp.dot(w_ref[2], h.astype(compute_dtype),
                  preferred_element_type=jnp.float32) + b_ref[2]
    o_ref[...] = out.astype(o_ref.dtype)


def init_ffunc_params(key, embed_dim, num_layers=2, dtype=jnp.float32):
    """Deterministic init mimicking PyTorch Linear defaults (uniform +-1/sqrt(fan_in))."""
    dims_in = [embed_dim + 2] + [embed_dim] * num_layers
    params = []
    for fan_in in dims_in:
        key, kw, kb = jax.random.split(key, 3)
        bound = 1.0 / math.sqrt(fan_in)
        w = jax.random.uniform(kw, (embed_dim, fan_in), dtype, -bound, bound)  # (out, in)
        b = jax.random.uniform(kb, (embed_dim,), dtype, -bound, bound)
        params.append((w, b))
    return params


def ffunc_forward(t, y, params, *, tn=2048, compute_dtype=jnp.bfloat16):
    """Pallas forward pass of FFunc.

    y: (N, D); t: scalar.  Returns (N, D) in y.dtype.
    `tn` is the lane (batch) tile; `compute_dtype` is the MXU-operand dtype
    (accumulation is always f32).
    """
    N, D = y.shape
    (w0, b0), (w1, b1), (w2, b2) = params

    # ---- wrapper-side glue (O(D) / O(D^2), done once) -----------------------
    t32 = jnp.asarray(t, dtype=jnp.float32)
    b0_eff = (b0.astype(jnp.float32)
              + jnp.sin(t32) * w0[:, D].astype(jnp.float32)
              + jnp.cos(t32) * w0[:, D + 1].astype(jnp.float32))          # (D,)

    w_stack = jnp.stack([w0[:, :D], w1, w2]).astype(compute_dtype)        # (3, D, D)
    b_stack = jnp.stack(
        [b0_eff, b1.astype(jnp.float32), b2.astype(jnp.float32)]
    ).reshape(3, D, 1)                                                    # (3, D, 1)

    # Lane tile: clamp so tiny N does not pay for a huge padded tile, keep >=128.
    tn = max(128, min(tn, ((N + 127) // 128) * 128))
    n_pad = pl.cdiv(N, tn) * tn

    # Present the problem transposed: batch on lanes (one XLA transpose each way).
    yT = y.T.astype(compute_dtype)                                        # (D, N)
    if n_pad != N:
        yT = jnp.pad(yT, ((0, 0), (0, n_pad - N)))

    outT = pl.pallas_call(
        functools.partial(_ffunc_kernel, compute_dtype=compute_dtype),
        out_shape=jax.ShapeDtypeStruct((D, n_pad), y.dtype),
        grid=(n_pad // tn,),
        in_specs=[
            pl.BlockSpec((D, tn), lambda i: (0, i)),        # y^T tile (batch on lanes)
            pl.BlockSpec((3, D, D), lambda i: (0, 0, 0)),   # stacked weights (resident)
            pl.BlockSpec((3, D, 1), lambda i: (0, 0, 0)),   # stacked biases (resident)
        ],
        out_specs=pl.BlockSpec((D, tn), lambda i: (0, i)),
        compiler_params=pltpu.CompilerParams(
            dimension_semantics=("parallel",)),
    )(yT, w_stack, b_stack)

    return outT[:, :N].T


def ffunc_reference(t, y, params):
    """Pure-JAX reference matching the PyTorch forward exactly (f32)."""
    N = y.shape[0]
    _t = jnp.ones((N, 1), dtype=y.dtype) * jnp.asarray(t, dtype=y.dtype)
    inp = jnp.concatenate([y, jnp.sin(_t), jnp.cos(_t)], axis=-1)
    (w0, b0), (w1, b1), (w2, b2) = params
    h = inp @ w0.T + b0
    h = jnp.tanh(h)
    h = h @ w1.T + b1
    h = jnp.tanh(h)
    return h @ w2.T + b2


if __name__ == "__main__":
    key = jax.random.PRNGKey(0)
    embed_dim = 32
    N = 1300          # multi-tile + non-divisible batch (exercises the padding path)
    t = 0.37

    kp, ky = jax.random.split(key)
    params = init_ffunc_params(kp, embed_dim, num_layers=2)
    y = jax.random.normal(ky, (N, embed_dim), dtype=jnp.float32)

    ref = ffunc_reference(t, y, params)

    # 1) f32 compute path (checks the structural rework exactly), several grid steps.
    out_f32 = jax.block_until_ready(
        ffunc_forward(t, y, params, tn=256, compute_dtype=jnp.float32))
    assert out_f32.shape == (N, embed_dim)
    assert jnp.allclose(out_f32, ref, atol=1e-5, rtol=1e-5), "f32 mismatch vs reference"

    # 2) bf16 MXU operands with f32 accumulation (default fast path).
    out_bf16 = jax.block_until_ready(ffunc_forward(t, y, params))
    assert out_bf16.shape == (N, embed_dim)
    assert jnp.allclose(out_bf16, ref, atol=2e-2, rtol=2e-2), "bf16 mismatch vs reference"

    print("KERNEL_OK")
</pallas_src>

<mosaic_0001>
module attributes {stable_mosaic.version = 11 : i64} {
  func.func @_ffunc_kernel(%arg0: i32, %arg1: memref<32x256xf32, #tpu.memory_space<vmem>>, %arg2: memref<3x32x32xf32, #tpu.memory_space<vmem>>, %arg3: memref<3x32x1xf32, #tpu.memory_space<vmem>>, %arg4: memref<32x256xf32, #tpu.memory_space<vmem>>) attributes {dimension_semantics = [#tpu.dimension_semantics<parallel>], iteration_bounds = array<i64: 6>, scalar_prefetch = 0 : i64, scratch_operands = 0 : i64, tpu.core_type = #tpu.core_type<tc>, window_params = [{transform_indices = @transform_0, window_bounds = array<i64: 32, 256>}, {pipeline_mode = #tpu.pipeline_mode<synchronous>, transform_indices = @transform_1, window_bounds = array<i64: 3, 32, 32>}, {pipeline_mode = #tpu.pipeline_mode<synchronous>, transform_indices = @transform_2, window_bounds = array<i64: 3, 32, 1>}, {transform_indices = @transform_3, window_bounds = array<i64: 32, 256>}]} {
    %c0 = arith.constant 0 : index
    %c0_0 = arith.constant 0 : index
    %c0_1 = arith.constant 0 : index
    %0 = vector.load %arg2[%c0, %c0_0, %c0_1] : memref<3x32x32xf32, #tpu.memory_space<vmem>>, vector<1x32x32xf32>
    %1 = vector.shape_cast %0 : vector<1x32x32xf32> to vector<32x32xf32>
    %c0_2 = arith.constant 0 : index
    %c0_3 = arith.constant 0 : index
    %2 = vector.load %arg1[%c0_2, %c0_3] : memref<32x256xf32, #tpu.memory_space<vmem>>, vector<32x256xf32>
    %cst = arith.constant dense<0.000000e+00> : vector<32x256xf32>
    %3 = tpu.matmul %1, %2, %cst {dimension_numbers = #tpu.dot_dimension_numbers<[1], [0], [0], [1], [0, 0, 1, 1], [], []>} : vector<32x32xf32>, vector<32x256xf32>, vector<32x256xf32> -> vector<32x256xf32>
    %c0_4 = arith.constant 0 : index
    %c0_5 = arith.constant 0 : index
    %c0_6 = arith.constant 0 : index
    %4 = vector.load %arg3[%c0_4, %c0_5, %c0_6] : memref<3x32x1xf32, #tpu.memory_space<vmem>>, vector<1x32x1xf32>
    %5 = vector.shape_cast %4 : vector<1x32x1xf32> to vector<32x1xf32>
    %6 = vector.broadcast %5 : vector<32x1xf32> to vector<32x256xf32>
    %7 = arith.addf %3, %6 : vector<32x256xf32>
    %8 = math.tanh %7 : vector<32x256xf32>
    %c1 = arith.constant 1 : index
    %c0_7 = arith.constant 0 : index
    %c0_8 = arith.constant 0 : index
    %9 = vector.load %arg2[%c1, %c0_7, %c0_8] : memref<3x32x32xf32, #tpu.memory_space<vmem>>, vector<1x32x32xf32>
    %10 = vector.shape_cast %9 : vector<1x32x32xf32> to vector<32x32xf32>
    %cst_9 = arith.constant dense<0.000000e+00> : vector<32x256xf32>
    %11 = tpu.matmul %10, %8, %cst_9 {dimension_numbers = #tpu.dot_dimension_numbers<[1], [0], [0], [1], [0, 0, 1, 1], [], []>} : vector<32x32xf32>, vector<32x256xf32>, vector<32x256xf32> -> vector<32x256xf32>
    %c1_10 = arith.constant 1 : index
    %c0_11 = arith.constant 0 : index
    %c0_12 = arith.constant 0 : index
    %12 = vector.load %arg3[%c1_10, %c0_11, %c0_12] : memref<3x32x1xf32, #tpu.memory_space<vmem>>, vector<1x32x1xf32>
    %13 = vector.shape_cast %12 : vector<1x32x1xf32> to vector<32x1xf32>
    %14 = vector.broadcast %13 : vector<32x1xf32> to vector<32x256xf32>
    %15 = arith.addf %11, %14 : vector<32x256xf32>
    %16 = math.tanh %15 : vector<32x256xf32>
    %c2 = arith.constant 2 : index
    %c0_13 = arith.constant 0 : index
    %c0_14 = arith.constant 0 : index
    %17 = vector.load %arg2[%c2, %c0_13, %c0_14] : memref<3x32x32xf32, #tpu.memory_space<vmem>>, vector<1x32x32xf32>
    %18 = vector.shape_cast %17 : vector<1x32x32xf32> to vector<32x32xf32>
    %cst_15 = arith.constant dense<0.000000e+00> : vector<32x256xf32>
    %19 = tpu.matmul %18, %16, %cst_15 {dimension_numbers = #tpu.dot_dimension_numbers<[1], [0], [0], [1], [0, 0, 1, 1], [], []>} : vector<32x32xf32>, vector<32x256xf32>, vector<32x256xf32> -> vector<32x256xf32>
    %c2_16 = arith.constant 2 : index
    %c0_17 = arith.constant 0 : index
    %c0_18 = arith.constant 0 : index
    %20 = vector.load %arg3[%c2_16, %c0_17, %c0_18] : memref<3x32x1xf32, #tpu.memory_space<vmem>>, vector<1x32x1xf32>
    %21 = vector.shape_cast %20 : vector<1x32x1xf32> to vector<32x1xf32>
    %22 = vector.broadcast %21 : vector<32x1xf32> to vector<32x256xf32>
    %23 = arith.addf %19, %22 : vector<32x256xf32>
    %c0_19 = arith.constant 0 : index
    %c0_20 = arith.constant 0 : index
    %24 = vector.load %arg4[%c0_19, %c0_20] : memref<32x256xf32, #tpu.memory_space<vmem>>, vector<32x256xf32>
    tpu.vector_store %arg4[%c0_19, %c0_20], %23 {strides = array<i32>} : memref<32x256xf32, #tpu.memory_space<vmem>>, vector<32x256xf32>,
    return
  }
  func.func @transform_0(%arg0: i32) -> (i32, i32) {
    %c0_i32 = arith.constant 0 : i32
    %c0_i32_0 = arith.constant 0 : i32
    return %c0_i32, %arg0 : i32, i32
  }
  func.func @transform_1(%arg0: i32) -> (i32, i32, i32) {
    %c0_i32 = arith.constant 0 : i32
    %c0_i32_0 = arith.constant 0 : i32
    %c0_i32_1 = arith.constant 0 : i32
    %c0_i32_2 = arith.constant 0 : i32
    return %c0_i32, %c0_i32_0, %c0_i32_1 : i32, i32, i32
  }
  func.func @transform_2(%arg0: i32) -> (i32, i32, i32) {
    %c0_i32 = arith.constant 0 : i32
    %c0_i32_0 = arith.constant 0 : i32
    %c0_i32_1 = arith.constant 0 : i32
    %c0_i32_2 = arith.constant 0 : i32
    return %c0_i32, %c0_i32_0, %c0_i32_1 : i32, i32, i32
  }
  func.func @transform_3(%arg0: i32) -> (i32, i32) {
    %c0_i32 = arith.constant 0 : i32
    %c0_i32_0 = arith.constant 0 : i32
    return %c0_i32, %arg0 : i32, i32
  }
}

</mosaic_0001>

<bundles_post_ra>
// kernel: tpu_custom_call.1
= control target key start
LH: loop header
LB: loop body
LE: loop exit
PB: predicated region body
PF: predicated region fallthrough
CT: control target
= control target key end

     0   :  { %8 = vsyncpa [#allocation3], 0  ;;  %s1113_s0 = inlined_call_operand.hbm [shape: f32[32,1536], index: 0, kind: input, shape index: {}]   ;;  %s1114_s1 = inlined_call_operand.vmem [shape: f32[3,32,32], index: 1, kind: input, shape index: {}]   ;;  %s1115_s2 = inlined_call_operand.vmem [shape: f32[3,32,1], index: 2, kind: input, shape index: {}]   ;;  %s1116_s3 = inlined_call_operand.hbm [shape: f32[32,1536], index: 3, kind: output, shape index: {}]  }
   0x1   :  { %10 = vsyncpa [#allocation3 + $0x1], 0 }
   0x2   :  { %11 = vsyncpa [#allocation4], 0 }
   0x3   :  { %13 = vsyncpa [#allocation4 + $0x1], 0  ;;  %s890_s12 = smov 0   ;;  %s892_s13 = smov 0  }
   0x4   :  { %s894_s14 = smov 0   ;;  %s896_s15 = smov 0  }
   0x5 LB: > { %s911_s16 = sadd.s32 4294967295, %s861_s15   ;;  %s613_s17 = sadd.s32 4294967294, %s861_s15   ;;  %s861_s15 = sphi %s896_s15, %s1125_s15   ;;  %s857_s14 = sphi %s894_s14, %s1124_s14   ;;  %s853_s13 = sphi %s892_s13, %s1123_s13   ;;  %s849_s12 = sphi %s890_s12, %s1122_s12  }
   0x6   : > { %s915_s18 = sadd.s32 1, %s861_s15   ;;  %s26_s19 = sadd.s32 1, %s857_s14 }
   0x7   : > { %s23_s20 = ssub.s32 %s861_s15, %s915_s18  ;;  %p33_p0 = scmp.ne.s32.totalorder %s857_s14, %s853_s13 }
   0x8   : > { %p24_p1 = scmp.eq.s32.totalorder %s23_s20, 0  ;;  %p34_p2 = scmp.eq.s32.totalorder %s861_s15, 0 }
   0x9   : > { %p39_p3 = scmp.ne.s32.totalorder %s853_s13, %s849_s12  ;;  %p40_p4 = scmp.eq.s32.totalorder %s911_s16, 0 }
   0xa   : > { %s927_s21 = scalar_select %p24_p1, %s857_s14, %s26_s19  }
   0xb   : > { %p929_p5 = por %p34_p2, %p33_p0  ;;  %p933_p6 = por %p40_p4, %p39_p3 }
   0xc   : > { %p105_p7 = scmp.eq.s32.totalorder %s911_s16, 5  ;;  %p111_p8 = scmp.eq.s32.totalorder %s613_s17, 5 }
   0xd   : > { %p689_p9 = scmp.lt.s32.totalorder %s861_s15, 6  ;;  %s137_s26 = sand.u32 1, %s857_s14  }
   0xe   : > { %p939_p10 = por %p105_p7, %p33_p0  ;;  %p943_p11 = por %p111_p8, %p39_p3 }
   0xf   : > { %s667_s27 = sshll.u32 %s861_s15, 4  ;;  %s616_s28 = sshll.u32 %s137_s26, 6 }
  0x10   : > { %s146_s4 = scalar_lea.hbm %s1113_s0, %s667_s27  ;;  %s141_s6 = scalar_lea.vmem [#allocation2], %s616_s28 }
  0x11   : > { %s147_s5 = sshll.u32 %s146_s4, 4  ;;  %s149_s7 = sshll.u32 %s141_s6, 4  ;;  %s148_s5 = int_to_ptr.hbm [resolvable:$true] %s147_s5  ;;  %s150_s7 = int_to_ptr.vmem [resolvable:$true] %s149_s7 }
  0x12   : > { %p954_p12 = pnand %p689_p9, %p929_p5  ;;  %p619_p13 = scmp.ge.s32.totalorder %s861_s15, 1 }
  0x13   : > { %s138_s9 = scalar_lea.sflag [#allocation3], %s137_s26  ;;  %s765_s10 = sshra.s32 %s148_s5, 4  ;;  %s766_s10 = int_to_ptr.hbm [resolvable:$true] %s765_s10 }
  0x14   : > { %s767_s11 = scalar_lea.hbm %s766_s10, 64  ;;  %p769_p1 = pneg %p954_p12 }
  0x15   : > { %p768_p0 = scmp.ne.s32.totalorder %s766_s10, %s767_s11  ;;  %s772_s20 = scalar_lea.hbm %s1113_s0, 384 }
  0x16   : > { %p773_p4 = scmp.lt.s32.totalorder %s766_s10, %s1113_s0  ;;  %p774_p5 = scmp.lt.s32.totalorder %s772_s20, %s767_s11 }
  0x17   : > { %p770_p2 = pnand %p769_p1, %p768_p0 }
  0x18   : > { %p775_p7 = por %p774_p5, %p773_p4 }
  0x19   : > { %p771_p3 = pneg %p770_p2 }
  0x1b   : > { %p776_p8 = pnand %p775_p7, %p771_p3 }
  0x1d   : > { %779 = shalt.err (!%p776_p8)
}
  0x1e   : > { %s863_s26 = smov 1536   ;;  %s864_s28 = smov 256  }
  0x1f   : > { %s865_s29 = smov 16   ;;  %p157_p9 = scmp.lt.s32.totalorder %s861_s15, 7 }
  0x20   : > { %684 = dma.hbm_to_vmem [thread:$0]  (!%p954_p12), %s148_s5, 1024, %s150_s7, %s138_s9, %s863_s26, %s864_s28, %s865_s29  }
  0x21   : > { %p158_p0 = pnand %p619_p13, %p157_p9 }
  0x22   : > { %s973_s30 = sand.u32 (!%p158_p0), 1, %s853_s13  }
  0x23   : > { %161 = sbr.rel (%p158_p0) target bundleno = 536 (0x218), region = 32  ;;  %s620_s4 = sshll.u32 (!%p158_p0), %s973_s30, 6 }
  0x24   : > { %s164_s6 = scalar_lea.sflag (!%p158_p0), [#allocation3], %s973_s30  ;;  %s167_s10 = scalar_lea.vmem (!%p158_p0), [#allocation2], %s620_s4 }
  0x28   : > { %840 = dma.done.wait (%p933_p6), %s164_s6, 1024  }
  0x29   : > { %842 = vsyncadd (%p933_p6), %s164_s6, 4294966272  ;;  %v866_v0 = vmov 0   ;;  %v203_v1 = vld [vmem:[%s167_s10 + $0x30] sm:$0xff]  ;;  %v204_v2 = vld [vmem:[%s167_s10 + $0x38] sm:$0xff]  ;;  %vm229_vm0 = vcmask 261120   ;;  %s190_s5 = scalar_lea.vmem [#allocation5], %s620_s4 }
  0x2a   : > { %730 = vset.pattern.permute.xlu0 %v866_v0  ;;  %731 = vset.pattern.permute.xlu1 %v866_v0  ;;  %v208_v3 = vld [vmem:[%s1115_s2 + $0x18] sm:$0xff]  ;;  %v201_v4 = vld [vmem:[%s167_s10 + $0x20] sm:$0xff]  ;;  %v202_v5 = vld [vmem:[%s167_s10 + $0x28] sm:$0xff]  ;;  %s668_s7 = sshll.u32 %s911_s16, 4  ;;  %s537_s9 = sshll.u32 %s190_s5, 4  ;;  %s538_s9 = int_to_ptr.vmem [resolvable:$true] %s537_s9 }
  0x2b   : > { %732 = vset.pattern.permute.xlu2 %v866_v0  ;;  %669 = vmatpush.msra.mxu2 %v203_v1  ;;  %v199_v6 = vld [vmem:[%s167_s10 + $0x10] sm:$0xff]  ;;  %v200_v7 = vld [vmem:[%s167_s10 + $0x18] sm:$0xff]  ;;  %v206_v8 = vld [vmem:[%s1115_s2 + $0x8] sm:$0xff]  ;;  %s536_s4 = scalar_lea.hbm %s1116_s3, %s668_s7  ;;  %s525_s16 = scalar_lea.sflag [#allocation4], %s973_s30 }
  0x2c   : > { %673 = vmatpush.msra.mxu3 %v204_v2  ;;  %226 = vperm.xlu0 %730, %v208_v3   ;;  %v197_v9 = vld [vmem:[%s167_s10] sm:$0xff]  ;;  %v198_v10 = vld [vmem:[%s167_s10 + $0x8] sm:$0xff]  ;;  %v195_v11 = vld [vmem:[%s1114_s1 + $0x10] sm:$0xff]  ;;  %s539_s11 = sshll.u32 %s536_s4, 4  ;;  %s815_s27 = scalar_lea.hbm %s1116_s3, 384  ;;  %s540_s11 = int_to_ptr.hbm [resolvable:$true] %s539_s11 }
  0x2d   : > { %254 = vmatpush.msra.mxu0 %v203_v1  ;;  %670 = vmatpush.msra.mxu2 %v201_v4  ;;  %v207_v12 = vld [vmem:[%s1115_s2 + $0x10] sm:$0xff]  ;;  %v193_v13 = vld [vmem:[%s1114_s1] sm:$0xff]  ;;  %v196_v15 = vld [vmem:[%s1114_s1 + $0x18] sm:$0xff]  ;;  %s809_s17 = sshra.s32 %s540_s11, 4  ;;  %s810_s17 = int_to_ptr.hbm [resolvable:$true] %s809_s17 }
  0x2e   : > { %674 = vmatpush.msra.mxu3 %v202_v5  ;;  %283 = vmatpush.msra.mxu1 %v204_v2  ;;  %v205_v14 = vld [vmem:[%s1115_s2] sm:$0xff]  ;;  %v635_v16 = vld [vmem:[%s1115_s2 + $0x28] sm:$0xff]  ;;  %v652_v20 = vld [vmem:[%s1115_s2 + $0x50] sm:$0xff]  ;;  %s811_s19 = scalar_lea.hbm %s810_s17, 64  ;;  %p816_p1 = scmp.lt.s32.totalorder %s810_s17, %s1116_s3 }
  0x2f   : > { %216 = vperm.xlu1 %731, %v206_v8   ;;  %671 = vmatpush.msra.mxu2 %v199_v6  ;;  %v194_v17 = vld [vmem:[%s1114_s1 + $0x8] sm:$0xff]  ;;  %v634_v18 = vld [vmem:[%s1115_s2 + $0x20] sm:$0xff]  ;;  %v637_v43 = vld [vmem:[%s1115_s2 + $0x38] sm:$0xff]  ;;  %p812_p6 = scmp.ne.s32.totalorder %s810_s17, %s811_s19  ;;  %p817_p2 = scmp.lt.s32.totalorder %s815_s27, %s811_s19 }
  0x30   : > { %675 = vmatpush.msra.mxu3 %v200_v7  ;;  %255 = vmatpush.msra.mxu0 %v201_v4  ;;  %v651_v19 = vld [vmem:[%s1115_s2 + $0x48] sm:$0xff]  ;;  %v630_v48 = vld [vmem:[%s1114_s1 + $0x20] sm:$0xff]  ;;  %v636_v51 = vld [vmem:[%s1115_s2 + $0x30] sm:$0xff] }
  0x31   : > { %284 = vmatpush.msra.mxu1 %v202_v5  ;;  %672 = vmatpush.msra.mxu2 %v197_v9  ;;  %v631_v52 = vld [vmem:[%s1114_s1 + $0x28] sm:$0xff]  ;;  %v650_v53 = vld [vmem:[%s1115_s2 + $0x40] sm:$0xff]  ;;  %v632_v54 = vld [vmem:[%s1114_s1 + $0x30] sm:$0xff]  ;;  %p813_p12 = pnand %p812_p6, %p939_p10  ;;  %p818_p3 = por %p817_p2, %p816_p1 }
  0x32   : > { %676 = vmatpush.msra.mxu3 %v198_v10  ;;  %624 = vmatmul.msk.f32.vlgmr.msra.gmra.mxu2 %vm229_vm0, %v195_v11  ;;  %v653_v55 = vld [vmem:[%s1115_s2 + $0x58] sm:$0xff] }
  0x33   : > { %628 = vmatmul.msk.f32.vlgmr.msra.gmra.mxu3 %vm229_vm0, %v195_v11  ;;  %256 = vmatpush.msra.mxu0 %v199_v6  ;;  %v633_v56 = vld [vmem:[%s1114_s1 + $0x38] sm:$0xff]  ;;  %p814_p13 = pneg %p813_p12 }
  0x34   : > { %285 = vmatpush.msra.mxu1 %v200_v7  ;;  %221 = vperm.xlu0 %730, %v207_v12  }
  0x35   : > { %257 = vmatpush.msra.mxu0 %v197_v9  ;;  %335 = vperm.xlu2 %732, %v637_v43   ;;  %p819_p4 = pnand %p818_p3, %p814_p13 }
  0x36   : > { %286 = vmatpush.msra.mxu1 %v198_v10  ;;  %622 = vmatmul.msk.f32.vlgmr.msra.gmra.mxu0 %vm229_vm0, %v193_v13 }
  0x37   : > { %626 = vmatmul.msk.f32.vlgmr.msra.gmra.mxu1 %vm229_vm0, %v193_v13  ;;  %211 = vperm.xlu1 %731, %v205_v14  }
  0x3a   : > { %625 = vmatmul.msk.f32.gmra.mxu2 %vm229_vm0, %v196_v15 }
  0x3b   : > { %629 = vmatmul.msk.f32.gmra.mxu3 %vm229_vm0, %v196_v15 }
  0x3c   : > { %325 = vperm.xlu0 %730, %v635_v16  }
  0x3d   : > { %330 = vperm.xlu2 %732, %v636_v51  }
  0x3e   : > { %623 = vmatmul.msk.f32.gmra.mxu0 %vm229_vm0, %v194_v17 }
  0x3f   : > { %627 = vmatmul.msk.f32.gmra.mxu1 %vm229_vm0, %v194_v17  ;;  %320 = vperm.xlu1 %731, %v634_v18  }
  0x44   : > { %433 = vperm.xlu0 %730, %v651_v19   ;;  %v646_v19 = vld [vmem:[%s1114_s1 + $0x40] sm:$0xff] }
  0x45   : > { %428 = vperm.xlu2 %732, %v650_v53  }
  0x47   : > { %438 = vperm.xlu1 %731, %v652_v20  }
  0x4d   : > { %443 = vperm.xlu2 %732, %v653_v55  }
  0x8f   : > { %v336_v61 = vpop.permute.xlu2 %335 }
  0x97   : > { %v331_v0 = vpop.permute.xlu2 %330 }
  0x9e   : > { %v227_v21 = vpop.permute.xlu0 %226 }
  0xa1   : > { %v217_v26 = vpop.permute.xlu1 %216 }
  0xa6   : > { %v222_v27 = vpop.permute.xlu0 %221 }
  0xa9   : > { %v212_v37 = vpop.permute.xlu1 %211 }
  0xae   : > { %v326_v5 = vpop.permute.xlu0 %325 }
  0xb1   : > { %v321_v9 = vpop.permute.xlu1 %320 }
  0xb3   : > { %v259_v22 = vpop.f32.mrf.mxu0 }
  0xb4   : > { %v288_v23 = vpop.f32.mrf.mxu1  ;;  %v260_v39 = vadd.f32 %v259_v22, %v212_v37  ;;  %v647_v22 = vld [vmem:[%s1114_s1 + $0x48] sm:$0xff] }
  0xb5   : > { %v265_v24 = vpop.f32.mrf.mxu2  ;;  %v289_v40 = vadd.f32 %v288_v23, %v212_v37  ;;  %v648_v23 = vld [vmem:[%s1114_s1 + $0x50] sm:$0xff] }
  0xb6   : > { %v294_v25 = vpop.f32.mrf.mxu3  ;;  %v266_v31 = vadd.f32 %v265_v24, %v222_v27  ;;  %v649_v24 = vld [vmem:[%s1114_s1 + $0x58] sm:$0xff] }
  0xb7   : > { %v295_v35 = vadd.f32 %v294_v25, %v222_v27  ;;  %v429_v25 = vpop.permute.xlu2 %428 }
  0xbb   : > { %v262_v28 = vpop.f32.mrf.mxu0 }
  0xbc   : > { %v291_v32 = vpop.f32.mrf.mxu1  ;;  %v263_v36 = vadd.f32 %v262_v28, %v217_v26 }
  0xbd   : > { %v268_v29 = vpop.f32.mrf.mxu2  ;;  %v292_v38 = vadd.f32 %v291_v32, %v217_v26 }
  0xbe   : > { %v297_v30 = vpop.f32.mrf.mxu3  ;;  %v269_v33 = vadd.f32 %v268_v29, %v227_v21 }
  0xbf   : > { %v298_v34 = vadd.f32 %v297_v30, %v227_v21  ;;  %v434_v30 = vpop.permute.xlu0 %433 }
  0xc0   : > { %733 = vtanh.f32 %v269_v33 }
  0xc1   : > { %735 = vtanh.f32 %v298_v34 }
  0xc2   : > { %737 = vtanh.f32 %v266_v31 }
  0xc3   : > { %739 = vtanh.f32 %v295_v35  ;;  %v439_v35 = vpop.permute.xlu1 %438 }
  0xc4   : > { %741 = vtanh.f32 %v263_v36 }
  0xc5   : > { %743 = vtanh.f32 %v292_v38 }
  0xc6   : > { %v734_v41 = vpop.eup %733  ;;  %745 = vtanh.f32 %v260_v39 }
  0xc7   : > { %v736_v42 = vpop.eup %735  ;;  %747 = vtanh.f32 %v289_v40  ;;  %362 = vmatpush.msrb.mxu2 %v734_v41  ;;  %v444_v40 = vpop.permute.xlu2 %443 }
  0xc8   : > { %v738_v44 = vpop.eup %737  ;;  %391 = vmatpush.msrb.mxu3 %v736_v42 }
  0xc9   : > { %v740_v45 = vpop.eup %739  ;;  %363 = vmatpush.msrb.mxu2 %v738_v44 }
  0xca   : > { %v742_v46 = vpop.eup %741  ;;  %392 = vmatpush.msrb.mxu3 %v740_v45 }
  0xcb   : > { %v744_v47 = vpop.eup %743  ;;  %364 = vmatpush.msrb.mxu2 %v742_v46 }
  0xcc   : > { %v746_v49 = vpop.eup %745  ;;  %393 = vmatpush.msrb.mxu3 %v744_v47 }
  0xcd   : > { %v748_v50 = vpop.eup %747  ;;  %365 = vmatpush.msrb.mxu2 %v746_v49 }
  0xce   : > { %394 = vmatpush.msrb.mxu3 %v748_v50  ;;  %638 = vmatmul.msk.f32.vlgmr.msrb.gmra.mxu2 %vm229_vm0, %v630_v48 }
  0xcf   : > { %642 = vmatmul.msk.f32.vlgmr.msrb.gmra.mxu3 %vm229_vm0, %v630_v48 }
  0xd6   : > { %639 = vmatmul.msk.f32.gmra.mxu2 %vm229_vm0, %v631_v52 }
  0xd7   : > { %643 = vmatmul.msk.f32.gmra.mxu3 %vm229_vm0, %v631_v52 }
  0xde   : > { %640 = vmatmul.msk.f32.gmra.mxu2 %vm229_vm0, %v632_v54 }
  0xdf   : > { %644 = vmatmul.msk.f32.gmra.mxu3 %vm229_vm0, %v632_v54 }
  0xe6   : > { %641 = vmatmul.msk.f32.gmra.mxu2 %vm229_vm0, %v633_v56 }
  0xe7   : > { %645 = vmatmul.msk.f32.gmra.mxu3 %vm229_vm0, %v633_v56 }
 0x151   : > { %v367_v57 = vpop.f32.mrf.mxu2 }
 0x152   : > { %v396_v58 = vpop.f32.mrf.mxu3  ;;  %v368_v11 = vadd.f32 %v367_v57, %v321_v9 }
 0x153   : > { %v397_v12 = vadd.f32 %v396_v58, %v321_v9 }
 0x159   : > { %v370_v59 = vpop.f32.mrf.mxu2 }
 0x15a   : > { %v399_v60 = vpop.f32.mrf.mxu3  ;;  %v371_v8 = vadd.f32 %v370_v59, %v326_v5 }
 0x15b   : > { %v400_v10 = vadd.f32 %v399_v60, %v326_v5 }
 0x161   : > { %v373_v62 = vpop.f32.mrf.mxu2 }
 0x162   : > { %v402_v63 = vpop.f32.mrf.mxu3  ;;  %v374_v2 = vadd.f32 %v373_v62, %v331_v0 }
 0x163   : > { %v403_v6 = vadd.f32 %v402_v63, %v331_v0 }
 0x169   : > { %v376_v1 = vpop.f32.mrf.mxu2 }
 0x16a   : > { %v377_v3 = vadd.f32 %v376_v1, %v336_v61  ;;  %v405_v4 = vpop.f32.mrf.mxu3 }
 0x16b   : > { %v406_v7 = vadd.f32 %v405_v4, %v336_v61 }
 0x16c   : > { %749 = vtanh.f32 %v377_v3 }
 0x16d   : > { %751 = vtanh.f32 %v406_v7 }
 0x16e   : > { %753 = vtanh.f32 %v374_v2 }
 0x16f   : > { %755 = vtanh.f32 %v403_v6 }
 0x170   : > { %757 = vtanh.f32 %v371_v8 }
 0x171   : > { %759 = vtanh.f32 %v400_v10 }
 0x172   : > { %v750_v13 = vpop.eup %749  ;;  %761 = vtanh.f32 %v368_v11 }
 0x173   : > { %v752_v14 = vpop.eup %751  ;;  %763 = vtanh.f32 %v397_v12  ;;  %470 = vmatpush.msrb.mxu0 %v750_v13 }
 0x174   : > { %v754_v15 = vpop.eup %753  ;;  %499 = vmatpush.msrb.mxu1 %v752_v14 }
 0x175   : > { %v756_v16 = vpop.eup %755  ;;  %471 = vmatpush.msrb.mxu0 %v754_v15 }
 0x176   : > { %v758_v17 = vpop.eup %757  ;;  %500 = vmatpush.msrb.mxu1 %v756_v16 }
 0x177   : > { %v760_v18 = vpop.eup %759  ;;  %472 = vmatpush.msrb.mxu0 %v758_v17 }
 0x178   : > { %v762_v20 = vpop.eup %761  ;;  %501 = vmatpush.msrb.mxu1 %v760_v18 }
 0x179   : > { %v764_v21 = vpop.eup %763  ;;  %473 = vmatpush.msrb.mxu0 %v762_v20 }
 0x17a   : > { %502 = vmatpush.msrb.mxu1 %v764_v21  ;;  %654 = vmatmul.msk.f32.vlgmr.msrb.gmra.mxu0 %vm229_vm0, %v646_v19 }
 0x17b   : > { %658 = vmatmul.msk.f32.vlgmr.msrb.gmra.mxu1 %vm229_vm0, %v646_v19 }
 0x182   : > { %655 = vmatmul.msk.f32.gmra.mxu0 %vm229_vm0, %v647_v22 }
 0x183   : > { %659 = vmatmul.msk.f32.gmra.mxu1 %vm229_vm0, %v647_v22 }
 0x18a   : > { %656 = vmatmul.msk.f32.gmra.mxu0 %vm229_vm0, %v648_v23 }
 0x18b   : > { %660 = vmatmul.msk.f32.gmra.mxu1 %vm229_vm0, %v648_v23 }
 0x192   : > { %657 = vmatmul.msk.f32.gmra.mxu0 %vm229_vm0, %v649_v24 }
 0x193   : > { %661 = vmatmul.msk.f32.gmra.mxu1 %vm229_vm0, %v649_v24 }
 0x1f7   : > { %v475_v26 = vpop.f32.mrf.mxu0 }
 0x1f8   : > { %v476_v27 = vadd.f32 %v475_v26, %v429_v25  ;;  %v504_v28 = vpop.f32.mrf.mxu1 }
 0x1f9   : > { %v505_v29 = vadd.f32 %v504_v28, %v429_v25 }
 0x1fa   : > { %516 = vst [vmem:[%s190_s5] sm:$0xff] %v476_v27 }
 0x1fb   : > { %517 = vst [vmem:[%s190_s5 + $0x8] sm:$0xff] %v505_v29 }
 0x1ff   : > { %v478_v31 = vpop.f32.mrf.mxu0 }
 0x200   : > { %v479_v32 = vadd.f32 %v478_v31, %v434_v30  ;;  %v507_v33 = vpop.f32.mrf.mxu1 }
 0x201   : > { %v508_v34 = vadd.f32 %v507_v33, %v434_v30 }
 0x202   : > { %518 = vst [vmem:[%s190_s5 + $0x10] sm:$0xff] %v479_v32 }
 0x203   : > { %519 = vst [vmem:[%s190_s5 + $0x18] sm:$0xff] %v508_v34 }
 0x207   : > { %v481_v36 = vpop.f32.mrf.mxu0 }
 0x208   : > { %v482_v37 = vadd.f32 %v481_v36, %v439_v35  ;;  %v510_v38 = vpop.f32.mrf.mxu1 }
 0x209   : > { %v511_v39 = vadd.f32 %v510_v38, %v439_v35 }
 0x20a   : > { %520 = vst [vmem:[%s190_s5 + $0x20] sm:$0xff] %v482_v37 }
 0x20b   : > { %521 = vst [vmem:[%s190_s5 + $0x28] sm:$0xff] %v511_v39 }
 0x20f   : > { %v484_v41 = vpop.f32.mrf.mxu0 }
 0x210   : > { %v485_v42 = vadd.f32 %v484_v41, %v444_v40  ;;  %v513_v43 = vpop.f32.mrf.mxu1 }
 0x211   : > { %v514_v44 = vadd.f32 %v513_v43, %v444_v40 }
 0x212   : > { %522 = vst [vmem:[%s190_s5 + $0x30] sm:$0xff] %v485_v42 }
 0x213   : > { %523 = vst [vmem:[%s190_s5 + $0x38] sm:$0xff] %v514_v44 }
 0x214   : > { %822 = shalt.err (!%p819_p4)
}
 0x215   : > { %s867_s30 = smov 256   ;;  %s868_s29 = smov 1536  }
 0x216   : > { %s869_s6 = smov 16  }
 0x217   : > { %679 = dma.vmem_to_hbm [thread:$0]  (%p939_p10), %s538_s9, 1024, %s540_s11, %s525_s16, %s867_s30, %s868_s29, %s869_s6  }
 0x218 PF: > { %p690_p5 = scmp.ge.s32.totalorder %s861_s15, 2  ;;  %s554_s10 = sand.u32 1, %s849_s12  }
 0x219   : > { %s555_s5 = scalar_lea.sflag [#allocation4], %s554_s10 }
 0x21a   : > { %p686_p7 = pnand %p690_p5, %p943_p11 }
 0x21c   : > { %p687_p8 = pneg %p686_p7 }
 0x21e   : > { %844 = dma.done.wait (%p687_p8), %s555_s5, 1024  }
 0x21f   : > { %846 = vsyncadd (%p687_p8), %s555_s5, 4294966272  ;;  %p16_p9 = scmp.ge.s32.totalorder %s915_s18, 8   ;;  %s1122_s12 = smov %s853_s13 }
 0x220   : > { %s1123_s13 = smov %s857_s14  ;;  %s1124_s14 = smov %s927_s21 }
 0x221   : > { %s1125_s15 = smov %s915_s18  ;;  %18 = sbr.rel (!%p16_p9) target bundleno = 5 (0x5), region = 81 }
 0x226   :  { %561 = vsyncpa [#allocation3], 1 }
 0x227   :  { %563 = vsyncpa [#allocation3 + $0x1], 1 }
 0x228   :  { %564 = vsyncpa [#allocation4], 1 }
 0x229   :  { %566 = vsyncpa [#allocation4 + $0x1], 1 }

</bundles_post_ra>
